<compile_context>
chip_gen: v7x
topology: tpu7x:2x2x1
jax: 0.10.0
libtpu: 0.0.40
codegen_flags: <defaults>
</compile_context>

<pallas_src>
import functools
import math

import jax
import jax.numpy as jnp
from jax import lax
from jax.experimental import pallas as pl
from jax.experimental.pallas import tpu as pltpu

KSIZE = 7
PAD = 3          # conv halo (rows) and minimum right column pad
LPAD = 8         # left column pad: >= PAD and a multiple of 8 (aligned slices)
LN_EPS = 1e-5
LANES = 128
CHUNK = 8        # conv/LN row sub-chunk (keeps the f32 accumulator small)


def _round_up(n, m):
    return ((n + m - 1) // m) * m


@functools.cache
def _roll_sign():
    """+1 if pltpu.roll follows jnp.roll semantics (positive shift moves data
    to higher indices), -1 otherwise.  Tiny one-off probe kernel (cached)."""
    def probe(x_ref, o_ref):
        o_ref[...] = pltpu.roll(x_ref[...], 1, 0)

    x = lax.broadcasted_iota(jnp.int32, (8, LANES), 0)
    out = pl.pallas_call(
        probe, out_shape=jax.ShapeDtypeStruct((8, LANES), jnp.int32))(x)
    return 1 if int(out[0, 0]) == 7 else -1


def _bottleneck_kernel(x_hbm, dww_ref, dwb_ref, g_ref, beta_ref,
                       w1_ref, b1_ref, w2_ref, b2_ref, ls_ref,
                       o_ref, xbuf, dma_sem, nbuf,
                       *, th, w, wtot, c_real, c_pad, roll_sign, exact_gelu):
    """One (batch, H-tile) step: prefetched strip -> conv+LN (chunked) -> MLP."""
    b = pl.program_id(0)
    t = pl.program_id(1)
    nt = pl.num_programs(1)
    slot = t % 2

    def start_fetch(tile, sl):
        pltpu.make_async_copy(
            x_hbm.at[b, pl.ds(tile * th, th + 2 * PAD)],
            xbuf.at[sl], dma_sem.at[sl]).start()

    # Prime this batch row's first strip.  The t axis is marked "arbitrary",
    # so every core that owns a (b, *) row starts that row at t == 0.
    @pl.when(t == 0)
    def _():
        start_fetch(0, 0)

    # Prefetch the next tile's strip into the other slot (double buffering).
    @pl.when(t + 1 < nt)
    def _():
        start_fetch(t + 1, 1 - slot)

    # Wait for the current tile's strip.
    pltpu.make_async_copy(
        x_hbm.at[b, pl.ds(t * th, th + 2 * PAD)],
        xbuf.at[slot], dma_sem.at[slot]).wait()

    taps = dww_ref[...]                       # (49, Cp) f32, loaded once
    inv_c = jnp.float32(1.0 / c_real)
    n_extra = c_pad - c_real

    # ---- depthwise 7x7 conv + LayerNorm, in row sub-chunks ------------------
    for r0 in range(0, th, CHUNK):
        rows = min(CHUNK, th - r0)
        flat_in = (rows + 2 * PAD) * wtot
        flat_out = rows * wtot
        # (rows+6, Wtot, Cp) -> ((rows+6)*Wtot, Cp): layout-free (Wtot % 8 == 0).
        xc = xbuf[slot, r0:r0 + rows + 2 * PAD].reshape(flat_in, c_pad)
        acc = jnp.zeros((flat_out, c_pad), jnp.float32)
        for kw in range(KSIZE):
            # kw shift via XLU roll: no sublane-misaligned retile copies.
            shift = (roll_sign * (PAD - kw)) % flat_in
            xs = pltpu.roll(xc, shift, 0)
            for kh in range(KSIZE):
                # kh shift: aligned sublane slice (offset kh*Wtot, Wtot % 8 == 0).
                win = xs[kh * wtot:kh * wtot + flat_out]
                acc = acc + win * taps[kh * KSIZE + kw]
        conv = acc.reshape(rows, wtot, c_pad)[:, LPAD:LPAD + w, :]
        conv = conv + dwb_ref[0]

        # LayerNorm over the real channels.  conv on padded lanes is exactly 0,
        # so the centered sum only needs a scalar correction for those lanes.
        mean = jnp.sum(conv, axis=-1, keepdims=True) * inv_c
        cent = conv - mean
        ssq = jnp.sum(cent * cent, axis=-1, keepdims=True)
        if n_extra:
            ssq = ssq - jnp.float32(n_extra) * mean * mean
        normed = cent * lax.rsqrt(ssq * inv_c + LN_EPS)
        normed = normed * g_ref[0] + beta_ref[0]          # padded lanes -> 0
        nbuf[r0:r0 + rows] = normed.astype(jnp.bfloat16)

    # ---- MLP on the whole tile: Linear -> GELU -> Linear (MXU, f32 acc) -----
    lhs = nbuf[...].reshape(th * w, c_pad)
    h1 = jnp.dot(lhs, w1_ref[...], preferred_element_type=jnp.float32)
    h1 = h1 + b1_ref[...]
    if exact_gelu:
        h1 = 0.5 * h1 * (1.0 + lax.erf(h1 * (1.0 / math.sqrt(2.0))))
    else:
        h1 = jax.nn.gelu(h1, approximate=True)            # tanh -> EUP, not VALU
    h2 = jnp.dot(h1.astype(jnp.bfloat16), w2_ref[...],
                 preferred_element_type=jnp.float32)
    h2 = (h2 + b2_ref[...]).reshape(th, w, c_pad)

    # ---- layer scale + residual (8-aligned interior of the strip) -----------
    xin = xbuf[slot, PAD:PAD + th, LPAD:LPAD + w, :]
    o_ref[...] = xin + ls_ref[0] * h2


def bottleneck_forward(x_nchw, params, tile_h=32, exact_gelu=False):
    """x_nchw: (B, C, H, W) float32. Returns (B, C, H, W) float32."""
    B, C, H, W = x_nchw.shape
    outch = params["w1"].shape[1]
    Cp = _round_up(C, LANES)
    Op = _round_up(outch, LANES)

    th = max(1, min(tile_h, H))
    nt = pl.cdiv(H, th)
    Hp = nt * th

    # Right column pad: >= PAD and chosen so LPAD + W + RPAD is a multiple of 8
    # (makes the in-kernel sublane flatten and interior slices layout-free).
    rpad = (-W) % 8
    if rpad < PAD:
        rpad += 8
    Wtot = LPAD + W + rpad

    # NCHW -> NHWC; channel pad to a lane-dense 128-multiple; aligned column
    # halo; 3-row conv halo plus the H tile remainder — one materialization.
    # TODO(synk): in a full model keep activations NHWC with C a 128-multiple
    # end-to-end so these boundary transposes/pads/slices disappear.
    x = jnp.transpose(x_nchw, (0, 2, 3, 1)).astype(jnp.float32)
    xp = jnp.pad(x, ((0, 0), (PAD, PAD + Hp - H), (LPAD, rpad), (0, Cp - C)))

    cpad = (0, Cp - C)
    opad = (0, Op - outch)
    dww = jnp.pad(params["dw_w"].astype(jnp.float32),
                  ((0, 0), (0, 0), cpad)).reshape(KSIZE * KSIZE, Cp)
    dwb = jnp.pad(params["dw_b"].astype(jnp.float32), cpad).reshape(1, Cp)
    ln_g = jnp.pad(params["ln_g"].astype(jnp.float32), cpad).reshape(1, Cp)
    ln_b = jnp.pad(params["ln_b"].astype(jnp.float32), cpad).reshape(1, Cp)
    w1 = jnp.pad(params["w1"], (cpad, opad)).astype(jnp.bfloat16)
    b1 = jnp.pad(params["b1"].astype(jnp.float32), opad).reshape(1, Op)
    w2 = jnp.pad(params["w2"], (opad, cpad)).astype(jnp.bfloat16)
    b2 = jnp.pad(params["b2"].astype(jnp.float32), cpad).reshape(1, Cp)
    ls = jnp.pad(params["layer_scale"].astype(jnp.float32), cpad).reshape(1, Cp)

    sq = pl.Squeezed()

    def const_spec(shape):
        return pl.BlockSpec(shape, lambda b, t, _n=len(shape): (0,) * _n)

    kernel = functools.partial(
        _bottleneck_kernel, th=th, w=W, wtot=Wtot, c_real=C, c_pad=Cp,
        roll_sign=_roll_sign(), exact_gelu=exact_gelu)

    out = pl.pallas_call(
        kernel,
        out_shape=jax.ShapeDtypeStruct((B, Hp, W, Cp), jnp.float32),
        grid_spec=pltpu.PrefetchScalarGridSpec(
            num_scalar_prefetch=0,
            grid=(B, nt),
            in_specs=[
                pl.BlockSpec(memory_space=pl.ANY),       # padded input (HBM)
                const_spec((KSIZE * KSIZE, Cp)),          # dw weight taps
                const_spec((1, Cp)),                      # dw bias
                const_spec((1, Cp)),                      # ln gamma
                const_spec((1, Cp)),                      # ln beta
                const_spec((Cp, Op)),                     # w1 (bf16)
                const_spec((1, Op)),                      # b1
                const_spec((Op, Cp)),                     # w2 (bf16)
                const_spec((1, Cp)),                      # b2
                const_spec((1, Cp)),                      # layer scale
            ],
            out_specs=pl.BlockSpec((sq, th, W, Cp), lambda b, t: (b, t, 0, 0)),
            scratch_shapes=[
                pltpu.VMEM((2, th + 2 * PAD, Wtot, Cp), jnp.float32),  # strip x2
                pltpu.SemaphoreType.DMA((2,)),
                pltpu.VMEM((th, W, Cp), jnp.bfloat16),                 # normed LHS
            ],
        ),
        compiler_params=pltpu.CompilerParams(
            # Batch axis parallel (v7x megacore); H-tile axis is arbitrary so
            # the manual strip prefetch (primed at t == 0) is valid on any core.
            dimension_semantics=("parallel", "arbitrary"),
            # TODO(synk): for large-C stages on v7x (64 MiB VMEM), single-buffer
            # w1/w2 (pipeline_mode=pl.Buffered(1)) and re-budget this limit.
            vmem_limit_bytes=32 * 1024 * 1024,
        ),
    )(xp, dww, dwb, ln_g, ln_b, w1, b1, w2, b2, ls)

    out = out[:, :H, :, :C]                  # drop padded rows / channels
    return jnp.transpose(out, (0, 3, 1, 2))


def bottleneck_ref(x_nchw, params):
    """Pure-JAX f32 reference (exact GELU) for correctness checking."""
    B, C, H, W = x_nchw.shape
    dw = jnp.transpose(params["dw_w"], (2, 0, 1))[:, None, :, :]     # (C,1,7,7)
    conv = lax.conv_general_dilated(
        x_nchw, dw, window_strides=(1, 1),
        padding=((PAD, PAD), (PAD, PAD)),
        feature_group_count=C,
        dimension_numbers=("NCHW", "OIHW", "NCHW"),
        precision=lax.Precision.HIGHEST)
    conv = conv + params["dw_b"][None, :, None, None]
    h = jnp.transpose(conv, (0, 2, 3, 1))                            # NHWC
    mean = jnp.mean(h, -1, keepdims=True)
    var = jnp.mean((h - mean) ** 2, -1, keepdims=True)
    h = (h - mean) / jnp.sqrt(var + LN_EPS)
    h = h * params["ln_g"] + params["ln_b"]
    h = jnp.dot(h, params["w1"], precision=lax.Precision.HIGHEST) + params["b1"]
    h = jax.nn.gelu(h, approximate=False)
    h = jnp.dot(h, params["w2"], precision=lax.Precision.HIGHEST) + params["b2"]
    out = jnp.transpose(h, (0, 3, 1, 2))                             # NCHW
    out = params["layer_scale"][None, :, None, None] * out
    return x_nchw + out


def init_params(key, inch, outch):
    ks = jax.random.split(key, 9)
    s = 0.2
    return {
        "layer_scale": jax.random.normal(ks[0], (inch,), jnp.float32) * s,
        "dw_w": jax.random.normal(ks[1], (KSIZE, KSIZE, inch), jnp.float32) * s,
        "dw_b": jax.random.normal(ks[2], (inch,), jnp.float32) * s,
        "ln_g": jnp.ones((inch,), jnp.float32)
                + jax.random.normal(ks[3], (inch,), jnp.float32) * 0.05,
        "ln_b": jax.random.normal(ks[4], (inch,), jnp.float32) * s,
        "w1": jax.random.normal(ks[5], (inch, outch), jnp.float32) * s,
        "b1": jax.random.normal(ks[6], (outch,), jnp.float32) * s,
        "w2": jax.random.normal(ks[7], (outch, inch), jnp.float32) * s,
        "b2": jax.random.normal(ks[8], (inch,), jnp.float32) * s,
    }


if __name__ == "__main__":
    B, INCH, OUTCH, H, W = 2, 4, 8, 16, 16
    key = jax.random.PRNGKey(0)
    kx, kp = jax.random.split(key)
    x = jax.random.normal(kx, (B, INCH, H, W), jnp.float32)
    params = init_params(kp, INCH, OUTCH)

    ref = jax.block_until_ready(bottleneck_ref(x, params))

    # tile_h=8 -> two H tiles per image (exercises the halo + strip-prefetch
    # path); tile_h=16 -> one full-height tile (M = th*W = 256 per matmul).
    for tile_h in (8, 16):
        out = jax.block_until_ready(bottleneck_forward(x, params, tile_h=tile_h))
        assert out.shape == (B, INCH, H, W), out.shape
        max_err = float(jnp.max(jnp.abs(out - ref)))
        # bf16 MXU matmuls + tanh-GELU (vs. the exact f32 reference) bound the
        # deviation; structural bugs (halo / roll / LN / padding) would show up
        # as O(0.1+) errors.
        assert max_err < 2e-2, f"tile_h={tile_h}: max abs error {max_err}"
    print("KERNEL_OK")
</pallas_src>

<mosaic_0001>
module attributes {stable_mosaic.version = 11 : i64} {
  func.func @probe(%arg0: memref<8x128xi32, #tpu.memory_space<vmem>>, %arg1: memref<8x128xi32, #tpu.memory_space<vmem>>) attributes {dimension_semantics = [], scalar_prefetch = 0 : i64, scratch_operands = 0 : i64, tpu.core_type = #tpu.core_type<tc>} {
    %c0 = arith.constant 0 : index
    %c0_0 = arith.constant 0 : index
    %0 = vector.load %arg0[%c0, %c0_0] : memref<8x128xi32, #tpu.memory_space<vmem>>, vector<8x128xi32>
    %c1_i32 = arith.constant 1 : i32
    %1 = tpu.dynamic_rotate %0 by %c1_i32 dim 0 : vector<8x128xi32>, i32 -> vector<8x128xi32>
    %c0_1 = arith.constant 0 : index
    %c0_2 = arith.constant 0 : index
    %2 = vector.load %arg1[%c0_1, %c0_2] : memref<8x128xi32, #tpu.memory_space<vmem>>, vector<8x128xi32>
    tpu.vector_store %arg1[%c0_1, %c0_2], %1 {strides = array<i32>} : memref<8x128xi32, #tpu.memory_space<vmem>>, vector<8x128xi32>,
    return
  }
}

</mosaic_0001>

<bundles_post_ra>
// kernel: tpu_custom_call.1
= control target key start
LH: loop header
LB: loop body
LE: loop exit
PB: predicated region body
PF: predicated region fallthrough
CT: control target
= control target key end

     0   :  { %6 = vsyncpa [#allocation3], 0  ;;  %s125_s0 = inlined_call_operand.hbm [shape: s32[8,128], index: 0, kind: input, shape index: {}]   ;;  %s126_s1 = inlined_call_operand.hbm [shape: s32[8,128], index: 1, kind: output, shape index: {}]  }
   0x1   :  { %7 = vsyncpa [#allocation4], 0  ;;  %s89_s6 = smov [#allocation2]   ;;  %s41_s10 = scalar_lea.hbm %s125_s0, 128 }
   0x2   :  { %s14_s7 = sshll.u32 %s89_s6, 4  ;;  %p42_p0 = scmp.ne.s32.totalorder %s125_s0, %s41_s10  ;;  %s15_s7 = int_to_ptr.vmem [resolvable:$true] %s14_s7 }
   0x3   :  { %p45_p1 = scmp.lt.u32.totalorder %s41_s10, %s125_s0 }
   0x5   :  { %p47_p2 = pnand %p45_p1, %p42_p0 }
   0x7   :  { %50 = shalt.err (!%p47_p2)
}
   0x8   :  { %s51_s15 = scalar_lea.vmem %s15_s7, 128  ;;  %p56_p4 = scmp.lt.s32.totalorder %s15_s7, %s15_s7 }
   0x9   :  { %p52_p3 = scmp.ne.s32.totalorder %s15_s7, %s51_s15  ;;  %p57_p5 = scmp.lt.s32.totalorder %s51_s15, %s51_s15 }
   0xb   :  { %p58_p6 = por %p57_p5, %p56_p4 }
   0xd   :  { %p59_p7 = pnand %p58_p6, %p52_p3 }
   0xf   :  { %62 = shalt.err (!%p59_p7)
}
  0x10   :  { %17 = dma.hbm_to_vmem [thread:$0]  %s125_s0, 128, %s15_s7, [#allocation3]  }
  0x11   :  { %85 = dma.done.wait [#allocation3], 128  }
  0x12   :  { %86 = vsyncadd [#allocation3], 4294967168  ;;  %s90_s18 = smov [#allocation5]   ;;  %v21_v0 = vld [vmem:[#allocation2] sm:$0xff] }
  0x13   :  { %s30_s19 = sshll.u32 %s90_s18, 4  ;;  %v22_v1 = vrot.slane %v21_v0, 7  ;;  %s31_s19 = int_to_ptr.vmem [resolvable:$true] %s30_s19 }
  0x14   :  { %s63_s20 = scalar_lea.vmem %s31_s19, 128  ;;  %p68_p9 = scmp.lt.s32.totalorder %s31_s19, %s31_s19 }
  0x15   :  { %23 = vst [vmem:[#allocation5] sm:$0xff] %v22_v1  ;;  %p64_p8 = scmp.ne.s32.totalorder %s31_s19, %s63_s20  ;;  %p69_p10 = scmp.lt.s32.totalorder %s63_s20, %s63_s20 }
  0x17   :  { %p70_p11 = por %p69_p10, %p68_p9 }
  0x19   :  { %p71_p12 = pnand %p70_p11, %p64_p8 }
  0x1b   :  { %74 = shalt.err (!%p71_p12)
}
  0x1c   :  { %s75_s23 = scalar_lea.hbm %s126_s1, 128 }
  0x1d   :  { %p76_p13 = scmp.ne.s32.totalorder %s126_s1, %s75_s23  ;;  %p79_p0 = scmp.lt.u32.totalorder %s75_s23, %s126_s1 }
  0x1f   :  { %p81_p1 = pnand %p79_p0, %p76_p13 }
  0x21   :  { %84 = shalt.err (!%p81_p1)
}
  0x22   :  { %33 = dma.vmem_to_hbm [thread:$0]  %s31_s19, 128, %s126_s1, [#allocation4]  }
  0x23   :  { %87 = dma.done.wait [#allocation4], 128  }
  0x24   :  { %88 = vsyncadd [#allocation4], 4294967168 }
  0x25   :  { %37 = vsyncpa [#allocation3], 1 }
  0x26   :  { %38 = vsyncpa [#allocation4], 1 }

</bundles_post_ra>
